<compile_context>
chip_gen: v5e
topology: v5e:2x2
jax: 0.10.0
libtpu: 0.0.40
codegen_flags: <defaults>
</compile_context>

<pallas_src>
import jax
import jax.numpy as jnp
import numpy as np
from jax.experimental import pallas as pl
from jax.experimental.pallas import tpu as pltpu


def _make_expand_kernel(s: int, w: int):
    K = s * w  # interleaved width produced per (h-row, s1)

    def kernel(x_ref, p_ref, o_ref):
        # x_ref: (s*s, 1, th, w)      input block, row s1*s + s2 = one channel plane
        # p_ref: (K, K) bf16          constant column-permutation matrix
        # o_ref: (1, 1, th, s*s*w)    lane-dense output block (full last dim)
        p = p_ref[...]
        pieces = []
        for s1 in range(s):  # static unroll; s (gain) is tiny, default 2
            # Lay the s2 streams side by side along lanes: (th, s*w)
            x_cat = jnp.concatenate(
                [x_ref[s1 * s + s2, 0, :, :] for s2 in range(s)], axis=-1
            )
            xf = x_cat.astype(jnp.float32)
            # Exact 3-way bf16 split: xf == hi + mid + lo, every piece exactly
            # representable in bf16, so each one-hot matmul is exact and the
            # (hi+mid)+lo re-sum reproduces xf bit-for-bit.
            hi = xf.astype(jnp.bfloat16)
            r1 = xf - hi.astype(jnp.float32)
            mid = r1.astype(jnp.bfloat16)
            lo = (r1 - mid.astype(jnp.float32)).astype(jnp.bfloat16)
            # Lane interleave on the MXU:
            #   rows[hh, j] = x_cat[hh, (j % s) * w + j // s]
            acc = jnp.dot(hi, p, preferred_element_type=jnp.float32)
            acc = acc + jnp.dot(mid, p, preferred_element_type=jnp.float32)
            acc = acc + jnp.dot(lo, p, preferred_element_type=jnp.float32)
            pieces.append(acc)
        # Output rows for s1 = 0..s-1 are contiguous in the (b, c', h, s*s*w)
        # output view, so one full-width lane-dense store covers all of them.
        out = jnp.concatenate(pieces, axis=-1)  # (th, s*s*w)
        o_ref[0, 0, :, :] = out.astype(o_ref.dtype)
        # TODO(synk): non-finite inputs (inf/nan) would be poisoned by the
        # 0*inf terms of the permutation matmul; a lane-gather interleave
        # would be needed to pass them through untouched.

    return kernel


def expand(x, gain: int = 2, *, target_block_bytes: int = 1 << 20):
    """Pallas TPU implementation of Expand.forward (depth-to-space, gain s)."""
    b, c, h, w = x.shape
    s = int(gain)
    assert c % (s * s) == 0, "channels must be divisible by gain**2"
    cp = c // (s * s)
    K = s * w
    out_lanes = s * s * w  # last dim of the output view handed to pallas_call

    # Free, row-major-compatible view: (b, c, h, w) -> (b*s*s, c', h, w).
    x4 = x.reshape(b * s * s, cp, h, w)

    # h-tile: as many rows as fit ~target_block_bytes per block; multiple of 8
    # (sublane) or the full h.  Keeps blocks big (amortizes the ~0.35us/step
    # pipeline overhead) while leaving lots of scoped-VMEM headroom.
    bytes_per_h_row = s * s * w * x.dtype.itemsize
    th = max(1, target_block_bytes // bytes_per_h_row)
    if th >= h:
        th = h
    else:
        th = max(8, (th // 8) * 8)
    n_h = pl.cdiv(h, th)

    # Constant one-hot matrix for the stride-s lane interleave:
    #   column j pulls from concatenated column (j % s) * w + j // s.
    jj = np.arange(K)
    p_np = np.zeros((K, K), dtype=np.float32)
    p_np[(jj % s) * w + jj // s, jj] = 1.0
    p_mat = jnp.asarray(p_np, dtype=jnp.bfloat16)

    out_view = pl.pallas_call(
        _make_expand_kernel(s, w),
        out_shape=jax.ShapeDtypeStruct((b, cp, h, out_lanes), x.dtype),
        grid=(b, cp, n_h),
        in_specs=[
            pl.BlockSpec((s * s, 1, th, w), lambda n, cc, ht: (n, cc, ht, 0)),
            pl.BlockSpec((K, K), lambda n, cc, ht: (0, 0)),
        ],
        out_specs=pl.BlockSpec((1, 1, th, out_lanes), lambda n, cc, ht: (n, cc, ht, 0)),
        compiler_params=pltpu.CompilerParams(
            dimension_semantics=("parallel", "parallel", "parallel"),
        ),
    )(x4, p_mat)

    # (b, c', h, s*s*w) -> (b, c', h*s, w*s): free row-major reshape.
    return out_view.reshape(b, cp, h * s, w * s)


def expand_ref(x, gain: int = 2):
    """Pure-JAX reference matching the PyTorch Expand.forward."""
    b, c, h, w = x.shape
    s = gain
    y = x.reshape(b, s, s, c // s**2, h, w)
    y = jnp.transpose(y, (0, 3, 4, 1, 5, 2))
    return y.reshape(b, c // s**2, h * s, w * s)


if __name__ == "__main__":
    key = jax.random.PRNGKey(0)
    # NCHW input like the PyTorch module: batch=2, channels=4, 16x16, gain=2.
    x = jax.random.normal(key, (2, 4, 16, 16), dtype=jnp.float32) * 4.0

    y = expand(x, gain=2)
    y = jax.block_until_ready(y)

    y_ref = expand_ref(x, gain=2)
    assert y.shape == y_ref.shape == (2, 1, 32, 32)
    assert y.dtype == x.dtype
    assert jnp.allclose(y, y_ref, atol=1e-5, rtol=1e-5), "mismatch vs reference"

    print("KERNEL_OK")
</pallas_src>

<mosaic_0001>
module attributes {stable_mosaic.version = 11 : i64} {
  func.func @kernel(%arg0: i32, %arg1: i32, %arg2: i32, %arg3: memref<4x1x16x16xf32, #tpu.memory_space<vmem>>, %arg4: memref<32x32xbf16, #tpu.memory_space<vmem>>, %arg5: memref<1x1x16x64xf32, #tpu.memory_space<vmem>>) attributes {dimension_semantics = [#tpu.dimension_semantics<parallel>, #tpu.dimension_semantics<parallel>, #tpu.dimension_semantics<parallel>], iteration_bounds = array<i64: 2, 1, 1>, scalar_prefetch = 0 : i64, scratch_operands = 0 : i64, tpu.core_type = #tpu.core_type<tc>, window_params = [{transform_indices = @transform_0, window_bounds = array<i64: 4, 1, 16, 16>}, {pipeline_mode = #tpu.pipeline_mode<synchronous>, transform_indices = @transform_1, window_bounds = array<i64: 32, 32>}, {transform_indices = @transform_2, window_bounds = array<i64: 1, 1, 16, 64>}]} {
    %c0 = arith.constant 0 : index
    %c0_0 = arith.constant 0 : index
    %0 = vector.load %arg4[%c0, %c0_0] : memref<32x32xbf16, #tpu.memory_space<vmem>>, vector<32x32xbf16>
    %c0_1 = arith.constant 0 : index
    %c0_2 = arith.constant 0 : index
    %c0_3 = arith.constant 0 : index
    %c0_4 = arith.constant 0 : index
    %1 = vector.load %arg3[%c0_1, %c0_2, %c0_3, %c0_4] : memref<4x1x16x16xf32, #tpu.memory_space<vmem>>, vector<1x1x16x16xf32>
    %2 = vector.shape_cast %1 : vector<1x1x16x16xf32> to vector<16x16xf32>
    %c1 = arith.constant 1 : index
    %c0_5 = arith.constant 0 : index
    %c0_6 = arith.constant 0 : index
    %c0_7 = arith.constant 0 : index
    %3 = vector.load %arg3[%c1, %c0_5, %c0_6, %c0_7] : memref<4x1x16x16xf32, #tpu.memory_space<vmem>>, vector<1x1x16x16xf32>
    %4 = vector.shape_cast %3 : vector<1x1x16x16xf32> to vector<16x16xf32>
    %5 = tpu.concatenate %2, %4 in 1 : vector<16x16xf32>, vector<16x16xf32> -> vector<16x32xf32>
    %6 = arith.truncf %5 : vector<16x32xf32> to vector<16x32xbf16>
    %7 = arith.extf %6 : vector<16x32xbf16> to vector<16x32xf32>
    %8 = arith.subf %5, %7 : vector<16x32xf32>
    %9 = arith.truncf %8 : vector<16x32xf32> to vector<16x32xbf16>
    %10 = arith.extf %9 : vector<16x32xbf16> to vector<16x32xf32>
    %11 = arith.subf %8, %10 : vector<16x32xf32>
    %12 = arith.truncf %11 : vector<16x32xf32> to vector<16x32xbf16>
    %cst = arith.constant dense<0.000000e+00> : vector<16x32xf32>
    %13 = tpu.matmul %6, %0, %cst {dimension_numbers = #tpu.dot_dimension_numbers<[1], [0], [0], [1], [0, 0, 1, 1], [], []>} : vector<16x32xbf16>, vector<32x32xbf16>, vector<16x32xf32> -> vector<16x32xf32>
    %cst_8 = arith.constant dense<0.000000e+00> : vector<16x32xf32>
    %14 = tpu.matmul %9, %0, %cst_8 {dimension_numbers = #tpu.dot_dimension_numbers<[1], [0], [0], [1], [0, 0, 1, 1], [], []>} : vector<16x32xbf16>, vector<32x32xbf16>, vector<16x32xf32> -> vector<16x32xf32>
    %15 = arith.addf %13, %14 : vector<16x32xf32>
    %cst_9 = arith.constant dense<0.000000e+00> : vector<16x32xf32>
    %16 = tpu.matmul %12, %0, %cst_9 {dimension_numbers = #tpu.dot_dimension_numbers<[1], [0], [0], [1], [0, 0, 1, 1], [], []>} : vector<16x32xbf16>, vector<32x32xbf16>, vector<16x32xf32> -> vector<16x32xf32>
    %17 = arith.addf %15, %16 : vector<16x32xf32>
    %c2 = arith.constant 2 : index
    %c0_10 = arith.constant 0 : index
    %c0_11 = arith.constant 0 : index
    %c0_12 = arith.constant 0 : index
    %18 = vector.load %arg3[%c2, %c0_10, %c0_11, %c0_12] : memref<4x1x16x16xf32, #tpu.memory_space<vmem>>, vector<1x1x16x16xf32>
    %19 = vector.shape_cast %18 : vector<1x1x16x16xf32> to vector<16x16xf32>
    %c3 = arith.constant 3 : index
    %c0_13 = arith.constant 0 : index
    %c0_14 = arith.constant 0 : index
    %c0_15 = arith.constant 0 : index
    %20 = vector.load %arg3[%c3, %c0_13, %c0_14, %c0_15] : memref<4x1x16x16xf32, #tpu.memory_space<vmem>>, vector<1x1x16x16xf32>
    %21 = vector.shape_cast %20 : vector<1x1x16x16xf32> to vector<16x16xf32>
    %22 = tpu.concatenate %19, %21 in 1 : vector<16x16xf32>, vector<16x16xf32> -> vector<16x32xf32>
    %23 = arith.truncf %22 : vector<16x32xf32> to vector<16x32xbf16>
    %24 = arith.extf %23 : vector<16x32xbf16> to vector<16x32xf32>
    %25 = arith.subf %22, %24 : vector<16x32xf32>
    %26 = arith.truncf %25 : vector<16x32xf32> to vector<16x32xbf16>
    %27 = arith.extf %26 : vector<16x32xbf16> to vector<16x32xf32>
    %28 = arith.subf %25, %27 : vector<16x32xf32>
    %29 = arith.truncf %28 : vector<16x32xf32> to vector<16x32xbf16>
    %cst_16 = arith.constant dense<0.000000e+00> : vector<16x32xf32>
    %30 = tpu.matmul %23, %0, %cst_16 {dimension_numbers = #tpu.dot_dimension_numbers<[1], [0], [0], [1], [0, 0, 1, 1], [], []>} : vector<16x32xbf16>, vector<32x32xbf16>, vector<16x32xf32> -> vector<16x32xf32>
    %cst_17 = arith.constant dense<0.000000e+00> : vector<16x32xf32>
    %31 = tpu.matmul %26, %0, %cst_17 {dimension_numbers = #tpu.dot_dimension_numbers<[1], [0], [0], [1], [0, 0, 1, 1], [], []>} : vector<16x32xbf16>, vector<32x32xbf16>, vector<16x32xf32> -> vector<16x32xf32>
    %32 = arith.addf %30, %31 : vector<16x32xf32>
    %cst_18 = arith.constant dense<0.000000e+00> : vector<16x32xf32>
    %33 = tpu.matmul %29, %0, %cst_18 {dimension_numbers = #tpu.dot_dimension_numbers<[1], [0], [0], [1], [0, 0, 1, 1], [], []>} : vector<16x32xbf16>, vector<32x32xbf16>, vector<16x32xf32> -> vector<16x32xf32>
    %34 = arith.addf %32, %33 : vector<16x32xf32>
    %35 = tpu.concatenate %17, %34 in 1 : vector<16x32xf32>, vector<16x32xf32> -> vector<16x64xf32>
    %c0_19 = arith.constant 0 : index
    %c0_20 = arith.constant 0 : index
    %c0_21 = arith.constant 0 : index
    %c0_22 = arith.constant 0 : index
    %36 = vector.load %arg5[%c0_19, %c0_20, %c0_21, %c0_22] : memref<1x1x16x64xf32, #tpu.memory_space<vmem>>, vector<1x1x16x64xf32>
    %37 = vector.shape_cast %36 : vector<1x1x16x64xf32> to vector<16x64xf32>
    %38 = vector.shape_cast %35 : vector<16x64xf32> to vector<1x1x16x64xf32>
    tpu.vector_store %arg5[%c0_19, %c0_20, %c0_21, %c0_22], %38 {strides = array<i32>} : memref<1x1x16x64xf32, #tpu.memory_space<vmem>>, vector<1x1x16x64xf32>,
    return
  }
  func.func @transform_0(%arg0: i32, %arg1: i32, %arg2: i32) -> (i32, i32, i32, i32) {
    %c0_i32 = arith.constant 0 : i32
    %c0_i32_0 = arith.constant 0 : i32
    return %arg0, %arg1, %arg2, %c0_i32 : i32, i32, i32, i32
  }
  func.func @transform_1(%arg0: i32, %arg1: i32, %arg2: i32) -> (i32, i32) {
    %c0_i32 = arith.constant 0 : i32
    %c0_i32_0 = arith.constant 0 : i32
    %c0_i32_1 = arith.constant 0 : i32
    return %c0_i32, %c0_i32_0 : i32, i32
  }
  func.func @transform_2(%arg0: i32, %arg1: i32, %arg2: i32) -> (i32, i32, i32, i32) {
    %c0_i32 = arith.constant 0 : i32
    %c0_i32_0 = arith.constant 0 : i32
    return %arg0, %arg1, %arg2, %c0_i32 : i32, i32, i32, i32
  }
}

</mosaic_0001>

<bundles_post_ra>
// kernel: tpu_custom_call.1
= control target key start
LH: loop header
LB: loop body
LE: loop exit
PB: predicated region body
PF: predicated region fallthrough
CT: control target
= control target key end

     0   :  { %7 = vsyncpa [#allocation3], 0  ;;  %s1023_s0 = inlined_call_operand.hbm [shape: f32[8,1,16,16], index: 0, kind: input, shape index: {}]   ;;  %s1024_s1 = inlined_call_operand.hbm [shape: bf16[32,32], index: 1, kind: input, shape index: {}]   ;;  %s1025_s2 = inlined_call_operand.hbm [shape: f32[2,1,16,64], index: 2, kind: output, shape index: {}]  }
   0x1   :  { %9 = vsyncpa [#allocation3 + $0x1], 0 }
   0x2   :  { %10 = vsyncpa [#allocation6], 0 }
   0x3   :  { %11 = vsyncpa [#allocation4], 0 }
   0x4   :  { %13 = vsyncpa [#allocation4 + $0x1], 0  ;;  %s851_s9 = smov 0   ;;  %s853_s10 = smov 0  }
   0x5   :  { %s855_s11 = smov 0   ;;  %s857_s12 = smov 0  }
   0x6   :  { %s859_s13 = smov 0   ;;  %s861_s14 = smov 0  }
   0x7 LB: > { %s555_s15 = sadd.s32 4294967295, %s825_s14   ;;  %s556_s16 = sadd.s32 4294967294, %s825_s14   ;;  %s825_s14 = sphi %s861_s14, %s19_s14   ;;  %s821_s13 = sphi %s859_s13, %s1037_s13   ;;  %s817_s12 = sphi %s857_s12, %s1036_s12   ;;  %s813_s11 = sphi %s855_s11, %s1035_s11   ;;  %s809_s10 = sphi %s853_s10, %s1034_s10   ;;  %s805_s9 = sphi %s851_s9, %s1033_s9  }
   0x8   : > { %p62_p0 = scmp.ne.s32.totalorder %s809_s10, %s805_s9  ;;  %p885_p1 = scmp.eq.s32.totalorder %s555_s15, 0 }
   0x9   : > { %p889_p2 = scmp.eq.s32.totalorder %s555_s15, 1  ;;  %p117_p3 = scmp.eq.s32.totalorder %s556_s16, 1 }
   0xa   : > { %p895_p4 = por %p885_p1, %p62_p0  ;;  %p557_p5 = scmp.ge.s32.totalorder %s825_s14, 1 }
   0xb   : > { %p900_p6 = por %p117_p3, %p62_p0  ;;  %p124_p7 = scmp.lt.s32.totalorder %s825_s14, 3 }
   0xc   : > { %s135_s23 = sshll.u32 %s1024_s1, 4  ;;  %s827_s25 = smov [#allocation5]   ;;  %s136_s23 = int_to_ptr.hbm [resolvable:$true] %s135_s23 }
   0xd   : > { %p908_p8 = pnand %p557_p5, %p124_p7  ;;  %s137_s26 = sshll.u32 %s827_s25, 4  ;;  %s138_s26 = int_to_ptr.vmem [resolvable:$true] %s137_s26 }
   0xe   : > { %p559_p11 = scmp.ge.s32.totalorder %s825_s14, 2  ;;  %s828_s27 = smov 64  }
   0xf   : > { %p606_p9 = pneg %p908_p8  ;;  %s829_s28 = smov 4  }
  0x10   : > { %s38_s29 = sadd.s32 1, %s821_s13  ;;  %s49_s30 = sadd.s32 1, %s813_s11 }
  0x11   : > { %p607_p10 = pnand %p606_p9, %p885_p1  ;;  %p40_p12 = scmp.ge.s32.totalorder %s38_s29, 2 }
  0x12   : > { %p56_p13 = scmp.ne.s32.totalorder %s813_s11, %s809_s10  ;;  %p57_p0 = scmp.eq.s32.totalorder %s825_s14, 0 }
  0x13   : > { %609 = dma.hbm_to_vmem [thread:$0]  (!%p607_p10), %s136_s23, 256, %s138_s26, [#allocation6], %s828_s27, %s828_s27, %s829_s28  }
  0x14   : > { %s1039_s29 = smov (%p40_p12, %s38_s29), 0  ;;  %p924_p3 = por %p57_p0, %p56_p13 }
  0x15   : > { %p930_p5 = por %p889_p2, %p56_p13  ;;  %s42_s5 = ssub.s32 %s821_s13, %s1039_s29 }
  0x16   : > { %p619_p7 = scmp.lt.s32.totalorder %s825_s14, 2  ;;  %p47_p9 = scmp.eq.s32.totalorder %s42_s5, 0 }
  0x17   : > { %s151_s6 = sand.u32 1, %s813_s11   ;;  %s594_s15 = sshll.u32 %s821_s13, 6 }
  0x18   : > { %s560_s7 = sshll.u32 %s151_s6, 6  ;;  %s165_s22 = scalar_lea.hbm %s1023_s0, %s594_s15 }
  0x19   : > { %s939_s8 = scalar_select %p47_p9, %s813_s11, %s49_s30  }
  0x1a   : > { %s155_s23 = scalar_lea.vmem [#allocation2], %s560_s7  ;;  %s166_s18 = sshll.u32 %s165_s22, 4  ;;  %s167_s18 = int_to_ptr.hbm [resolvable:$true] %s166_s18 }
  0x1b   : > { %s168_s25 = sshll.u32 %s155_s23, 4  ;;  %p611_p2 = pnand %p619_p7, %p924_p3  ;;  %s169_s25 = int_to_ptr.vmem [resolvable:$true] %s168_s25 }
  0x1c   : > { %s152_s26 = scalar_lea.sflag [#allocation3], %s151_s6  ;;  %s830_s27 = smov 128  }
  0x1d   : > { %s831_s28 = smov 8   ;;  %180 = sbr.rel (%p908_p8) target bundleno = 425 (0x1a9), region = 28 }
  0x1e   : > { %613 = dma.hbm_to_vmem [thread:$0]  (!%p611_p2), %s167_s18, 1024, %s169_s25, %s152_s26, %s830_s27, %s830_s27, %s831_s28  }
  0x1f   : > { %s950_s30 = sand.u32 (!%p908_p8), 1, %s809_s10  }
  0x20   : > { %s565_s5 = sshll.u32 (!%p908_p8), %s950_s30, 6  ;;  %s183_s7 = scalar_lea.sflag (!%p908_p8), [#allocation3], %s950_s30 }
  0x21   : > { %s954_s15 = scalar_lea.vmem (!%p908_p8), [#allocation2], %s565_s5 }
  0x22   : > { %792 = dma.done.wait (%p895_p4), %s183_s7, 1024  }
  0x23   : > { %794 = vsyncadd (%p895_p4), %s183_s7, 4294966272 }
  0x24   : > { %796 = dma.done.wait (%p885_p1), [#allocation6], 256  }
  0x25   : > { %798 = vsyncadd (%p885_p1), [#allocation6], 4294967040  ;;  %v583_v0 = vld [vmem:[%s954_s15 + $0x30] sm:$0xff]  ;;  %s832_s24 = smov 16   ;;  %v584_v2 = vld [vmem:[%s954_s15 + $0x38] sm:$0xff]  ;;  %vm234_vm0 = vcmask 130048  }
  0x26   : > { %v568_v1 = vld [vmem:[%s954_s15 + $0x10] sm:$0xff]  ;;  %334 = vrot.lane.b32.xlu1 %v583_v0, %s832_s24  ;;  %v569_v3 = vld [vmem:[%s954_s15 + $0x18] sm:$0xff]  ;;  %v596_v4 = vld [vmem:[#allocation5 + $0x8] sm:$0xff]  ;;  %vm267_vm1 = vcmask 261120   ;;  %s833_s17 = smov 32   ;;  %s567_s19 = sshll.u32 %s950_s30, 4 }
  0x27   : > { %228 = vrot.lane.b32.xlu0 %v568_v1, %s832_s24  ;;  %299 = vmatpush.bf16.msra.mxu1 %v596_v4  ;;  %v595_v5 = vld [vmem:[#allocation5] sm:$0xff]  ;;  %v582_v15 = vld [vmem:[%s954_s15 + $0x28] sm:$0xff]  ;;  %s597_s3 = sshll.u32 %s817_s12, 4  ;;  %vm428_vm2 = vcmask 523264   ;;  %s212_s22 = scalar_lea.vmem [#allocation7], %s567_s19 }
  0x28   : > { %277 = vmatpush.bf16.msra.mxu0 %v596_v4  ;;  %369 = vmatpush.bf16.msra.mxu3 %v596_v4  ;;  %v581_v6 = vld [vmem:[%s954_s15 + $0x20] sm:$0xff]  ;;  %v222_v16 = vld [vmem:[%s954_s15 + $0x8] sm:$0xff]  ;;  %s447_s21 = scalar_lea.hbm %s1025_s2, %s597_s3  ;;  %s448_s23 = sshll.u32 %s212_s22, 4  ;;  %s449_s23 = int_to_ptr.vmem [resolvable:$true] %s448_s23 }
  0x29   : > { %316 = vmatpush.bf16.msra.mxu2 %v596_v4  ;;  %v221_v7 = vld [vmem:[%s954_s15] sm:$0xff]  ;;  %s450_s25 = sshll.u32 %s447_s21, 4  ;;  %s432_s12 = scalar_lea.sflag [#allocation4], %s950_s30  ;;  %s451_s25 = int_to_ptr.hbm [resolvable:$true] %s450_s25 }
  0x2a   : > { %s753_s18 = sshra.s32 %s451_s25, 4  ;;  %s759_s5 = scalar_lea.hbm %s1025_s2, 32  ;;  %s754_s18 = int_to_ptr.hbm [resolvable:$true] %s753_s18 }
  0x2b   : > { %300 = vmatpush.bf16.msra.mxu1 %v595_v5  ;;  %s755_s26 = scalar_lea.hbm %s754_s18, 16  ;;  %p760_p10 = scmp.lt.s32.totalorder %s754_s18, %s1025_s2 }
  0x2c   : > { %278 = vmatpush.bf16.msra.mxu0 %v595_v5  ;;  %370 = vmatpush.bf16.msra.mxu3 %v595_v5  ;;  %p756_p1 = scmp.ne.s32.totalorder %s754_s18, %s755_s26  ;;  %p761_p12 = scmp.lt.s32.totalorder %s759_s5, %s755_s26 }
  0x2d   : > { %317 = vmatpush.bf16.msra.mxu2 %v595_v5 }
  0x2e   : > { %336 = vrot.lane.b32.xlu1 %v584_v2, %s832_s24  ;;  %p757_p4 = pnand %p756_p1, %p930_p5  ;;  %p762_p13 = por %p761_p12, %p760_p10 }
  0x2f   : > { %230 = vrot.lane.b32.xlu0 %v569_v3, %s832_s24  ;;  %408 = vmatpush.bf16.msrb.mxu1 %v596_v4 }
  0x30   : > { %391 = vmatpush.bf16.msrb.mxu0 %v596_v4  ;;  %p758_p8 = pneg %p757_p4 }
  0x32   : > { %p763_p0 = pnand %p762_p13, %p758_p8 }
  0x33   : > { %409 = vmatpush.bf16.msrb.mxu1 %v595_v5 }
  0x34   : > { %392 = vmatpush.bf16.msrb.mxu0 %v595_v5 }
  0x98   : > { %v335_v8 = vpop.permute.xlu1 %334 }
  0x99   : > { %v229_v9 = vpop.permute.xlu0 %228  ;;  %v340_v10 = vsel %vm234_vm0, %v581_v6, %v335_v8 }
  0x9a   : > { %v235_v11 = vsel %vm234_vm0, %v221_v7, %v229_v9  ;;  %v342_v13 = vpack.c.bf16 %v340_v10, %v340_v10 }
  0x9b   : > { %v237_v12 = vpack.c.bf16 %v235_v11, %v235_v11 }
  0x9c   : > { %v344_v17 = vunpack.c.l.bf16 %v342_v13  ;;  %v379_v53 = vunpack.c.l.b16 %v342_v13 }
  0x9d   : > { %v239_v14 = vunpack.c.l.bf16 %v237_v12  ;;  %v287_v28 = vunpack.c.l.b16 %v237_v12 }
  0x9e   : > { %v346_v25 = vsub.f32 %v340_v10, %v344_v17 }
  0x9f   : > { %v241_v20 = vsub.f32 %v235_v11, %v239_v14 }
  0xa0   : > { %v337_v18 = vpop.permute.xlu1 %336  ;;  %v348_v34 = vpack.c.bf16 %v346_v25, %v346_v25 }
  0xa1   : > { %v231_v19 = vpop.permute.xlu0 %230  ;;  %v341_v21 = vsel %vm234_vm0, %v582_v15, %v337_v18  ;;  %v243_v27 = vpack.c.bf16 %v241_v20, %v241_v20 }
  0xa2   : > { %v236_v22 = vsel %vm234_vm0, %v222_v16, %v231_v19  ;;  %v343_v23 = vpack.c.bf16 %v341_v21, %v341_v21  ;;  %v357_v38 = vunpack.c.l.b16 %v348_v34  ;;  %v350_v49 = vunpack.c.l.bf16 %v348_v34 }
  0xa3   : > { %v238_v24 = vpack.c.bf16 %v236_v22, %v236_v22  ;;  %v245_v36 = vunpack.c.l.bf16 %v243_v27  ;;  %v252_v41 = vunpack.c.l.b16 %v243_v27 }
  0xa4   : > { %v345_v26 = vunpack.c.l.bf16 %v343_v23  ;;  %v352_v51 = vsub.f32 %v346_v25, %v350_v49  ;;  %v380_v54 = vunpack.c.l.b16 %v343_v23 }
  0xa5   : > { %v240_v29 = vunpack.c.l.bf16 %v238_v24  ;;  %v288_v30 = vunpack.c.l.b16 %v238_v24  ;;  %v247_v44 = vsub.f32 %v241_v20, %v245_v36 }
  0xa6   : > { %v347_v31 = vsub.f32 %v341_v21, %v345_v26  ;;  %v381_v55 = vpack.c.b16 %v380_v54, %v379_v53 }
  0xa7   : > { %v242_v32 = vsub.f32 %v236_v22, %v240_v29  ;;  %v289_v33 = vpack.c.b16 %v288_v30, %v287_v28 }
  0xa8   : > { %v349_v35 = vpack.c.bf16 %v347_v31, %v347_v31 }
  0xa9   : > { %v244_v37 = vpack.c.bf16 %v242_v32, %v242_v32  ;;  %579 = vmatmul.msk.bf16.vlgmr.msra.gmra.mxu1 %vm267_vm1, %v289_v33 }
  0xaa   : > { %v358_v39 = vunpack.c.l.b16 %v349_v35  ;;  %v351_v47 = vunpack.c.l.bf16 %v349_v35 }
  0xab   : > { %v246_v40 = vunpack.c.l.bf16 %v244_v37  ;;  %v253_v42 = vunpack.c.l.b16 %v244_v37 }
  0xac   : > { %v359_v43 = vpack.c.b16 %v358_v39, %v357_v38  ;;  %v353_v50 = vsub.f32 %v347_v31, %v351_v47 }
  0xad   : > { %v248_v45 = vsub.f32 %v242_v32, %v246_v40  ;;  %v254_v46 = vpack.c.b16 %v253_v42, %v252_v41 }
  0xae   : > { %585 = vmatmul.msk.bf16.vlgmr.msra.gmra.mxu3 %vm267_vm1, %v359_v43  ;;  %v354_v52 = vpack.c.bf16 %v353_v50, %v352_v51 }
  0xaf   : > { %578 = vmatmul.msk.bf16.vlgmr.msra.gmra.mxu0 %vm267_vm1, %v254_v46  ;;  %v249_v48 = vpack.c.bf16 %v248_v45, %v247_v44 }
  0xb1   : > { %580 = vmatmul.msk.bf16.vlgmr.msra.gmra.mxu2 %vm267_vm1, %v249_v48 }
  0xb9   : > { %587 = vmatmul.msk.bf16.vlgmr.msrb.gmra.mxu1 %vm267_vm1, %v354_v52 }
  0xbf   : > { %586 = vmatmul.msk.bf16.vlgmr.msrb.gmra.mxu0 %vm267_vm1, %v381_v55 }
 0x126   : > { %v302_v56 = vpop.f32.mrf.mxu1 }
 0x12c   : > { %v280_v57 = vpop.f32.mrf.mxu0 }
 0x12d   : > { %v303_v58 = vadd.f32 %v302_v56, %v280_v57 }
 0x12e   : > { %v304_v59 = vpop.f32.mrf.mxu1 }
 0x131   : > { %v372_v62 = vpop.f32.mrf.mxu3 }
 0x134   : > { %v282_v60 = vpop.f32.mrf.mxu0  ;;  %v319_v8 = vpop.f32.mrf.mxu2 }
 0x135   : > { %v305_v61 = vadd.f32 %v304_v59, %v282_v60  ;;  %v324_v9 = vadd.f32 %v319_v8, %v303_v58 }
 0x136   : > { %v411_v63 = vpop.f32.mrf.mxu1 }
 0x139   : > { %v374_v3 = vpop.f32.mrf.mxu3 }
 0x13c   : > { %v394_v0 = vpop.f32.mrf.mxu0  ;;  %v321_v12 = vpop.f32.mrf.mxu2 }
 0x13d   : > { %v395_v1 = vadd.f32 %v394_v0, %v372_v62  ;;  %v325_v13 = vadd.f32 %v321_v12, %v305_v61 }
 0x13e   : > { %v413_v6 = vpop.f32.mrf.mxu1 }
 0x13f   : > { %v416_v2 = vadd.f32 %v411_v63, %v395_v1 }
 0x141   : > { %420 = vrot.lane.b32.xlu2 %v416_v2, %s833_s17 }
 0x144   : > { %v396_v4 = vpop.f32.mrf.mxu0 }
 0x145   : > { %v397_v5 = vadd.f32 %v396_v4, %v374_v3 }
 0x147   : > { %v417_v7 = vadd.f32 %v413_v6, %v397_v5 }
 0x149   : > { %422 = vrot.lane.b32.xlu2 %v417_v7, %s833_s17 }
 0x19b   : > { %v421_v10 = vpop.permute.xlu2 %420 }
 0x19c   : > { %v426_v11 = vsel %vm267_vm1, %v324_v9, %v421_v10 }
 0x19d   : > { %429 = vst.msk [vmem:[%s212_s22] sm:$0xff] %vm428_vm2, %v426_v11 }
 0x1a3   : > { %v423_v14 = vpop.permute.xlu2 %422 }
 0x1a4   : > { %v427_v15 = vsel %vm267_vm1, %v325_v13, %v423_v14 }
 0x1a5   : > { %430 = vst.msk [vmem:[%s212_s22 + $0x8] sm:$0xff] %vm428_vm2, %v427_v15 }
 0x1a6   : > { %766 = shalt.err (!%p763_p0)
}
 0x1a7   : > { %s834_s30 = smov 128   ;;  %s835_s24 = smov 8  }
 0x1a8   : > { %604 = dma.vmem_to_hbm [thread:$0]  (%p930_p5), %s449_s23, 256, %s451_s25, %s432_s12, %s834_s30, %s834_s30, %s835_s24  }
 0x1a9 PF: > { %s465_s17 = sand.u32 1, %s805_s9   ;;  %p615_p3 = pnand %p559_p11, %p900_p6 }
 0x1aa   : > { %s466_s19 = scalar_lea.sflag [#allocation4], %s465_s17 }
 0x1ab   : > { %p616_p7 = pneg %p615_p3 }
 0x1ad   : > { %800 = dma.done.wait (%p616_p7), %s466_s19, 256  }
 0x1ae   : > { %802 = vsyncadd (%p616_p7), %s466_s19, 4294967040  ;;  %s19_s14 = sadd.s32 1, %s825_s14   ;;  %s1033_s9 = smov %s809_s10 }
 0x1af   : > { %p16_p9 = scmp.ge.s32.totalorder %s19_s14, 4   ;;  %s1034_s10 = smov %s813_s11 }
 0x1b0   : > { %s1035_s11 = smov %s939_s8  ;;  %s1036_s12 = smov %s821_s13 }
 0x1b1   : > { %s1037_s13 = smov %s1039_s29  ;;  %18 = sbr.rel (!%p16_p9) target bundleno = 7 (0x7), region = 80 }
 0x1b6   :  { %472 = vsyncpa [#allocation3], 1 }
 0x1b7   :  { %474 = vsyncpa [#allocation3 + $0x1], 1 }
 0x1b8   :  { %475 = vsyncpa [#allocation6], 1 }
 0x1b9   :  { %476 = vsyncpa [#allocation4], 1 }
 0x1ba   :  { %478 = vsyncpa [#allocation4 + $0x1], 1 }

</bundles_post_ra>
